<compile_context>
chip_gen: v7x
topology: tpu7x:2x2x1
jax: 0.10.0
libtpu: 0.0.40
codegen_flags: <defaults>
</compile_context>

<pallas_src>
import functools

import numpy as np
import jax
import jax.numpy as jnp
from jax import lax
from jax.experimental import pallas as pl
from jax.experimental.pallas import tpu as pltpu


# ---------------------------------------------------------------------------
# Pallas kernel
# ---------------------------------------------------------------------------

def fused_dro_kernel(x_ref, y_ref, w_ref, b_ref, m_ref, out_ref, *,
                     num_classes, epsilon):
    """Fused per-row statistics for one row tile of the batch.

    From a single read of x and one [TN, D] x [D, K+1] logits matmul produce,
    per row:
      out[:, 0] = CE over all K+1 classes (label y)        -> K+1 loss term
      out[:, 1] = CE over the first K classes (label y)    -> DRO loss term
      out[:, 2] = ||d CE_K / d x||_2  (Gram quadratic form) -> DRO grad penalty
      out[:, 3] = K+1 CE of the logit-space virtual-OOD sample, label = K
    Nothing of size [*, D] other than the x tile itself ever exists.
    """
    K = num_classes
    x = x_ref[...]                                   # [TN, D]   f32
    lab = y_ref[...]                                 # [TN, 1]   int32 (labels < K)
    w = w_ref[...]                                   # [D, K+1]  f32
    b = b_ref[...]                                   # [1, K+1]  f32
    M = m_ref[...]                                   # [K, K+1]  f32 = w_K^T @ w

    tn = x.shape[0]
    C = w.shape[1]                                   # K + 1

    logits = jnp.dot(x, w, preferred_element_type=jnp.float32) + b     # [TN, C]

    # Label mask built in-kernel (no one-hot input stream).  Labels are < K,
    # so the label logit is shared by the K-way and (K+1)-way losses.
    col = lax.broadcasted_iota(jnp.int32, (tn, C), 1)
    onehot = jnp.where(col == lab, 1.0, 0.0)                            # [TN, C]
    label_logit = jnp.sum(onehot * logits, axis=-1, keepdims=True)      # [TN, 1]

    # K+1-way cross entropy.
    m1 = jnp.max(logits, axis=-1, keepdims=True)
    lse1 = m1 + jnp.log(jnp.sum(jnp.exp(logits - m1), axis=-1, keepdims=True))
    ce_kp1 = lse1 - label_logit

    # K-way cross entropy on the first K logits.
    logits_k = logits[:, :K]
    mk = jnp.max(logits_k, axis=-1, keepdims=True)
    lsek = mk + jnp.log(jnp.sum(jnp.exp(logits_k - mk), axis=-1, keepdims=True))
    ce_k = lsek - label_logit

    # Input-gradient norm of the K-way CE for the linear classifier:
    #   grad = dlogits @ W_K^T,  ||grad||^2 = dlogits @ (W_K^T W_K) @ dlogits^T
    # using the precomputed Gram block M[:, :K]; the [TN, D] gradient is never
    # materialized.
    p = jnp.exp(logits_k - lsek)                                        # softmax_K
    dlogits = p - onehot[:, :K]                                         # [TN, K]
    dM = jnp.dot(dlogits, M, preferred_element_type=jnp.float32)        # [TN, C]
    gnorm2 = jnp.sum(dM[:, :K] * dlogits, axis=-1, keepdims=True)
    gnorm = jnp.sqrt(jnp.maximum(gnorm2, 0.0))                          # [TN, 1]

    # Virtual-OOD sample entirely in logit space:
    #   logits(x + eps * grad/(||grad||+1e-8)) = logits + eps/(||g||+1e-8)*dM
    # (exact division, not approx reciprocal, to stay within the f32 1e-4
    # validation tolerance).
    scale = epsilon / (gnorm + 1e-8)
    vlogits = logits + scale * dM                                        # [TN, C]
    mv = jnp.max(vlogits, axis=-1, keepdims=True)
    lsev = mv + jnp.log(jnp.sum(jnp.exp(vlogits - mv), axis=-1, keepdims=True))
    ce_v = lsev - vlogits[:, K:K + 1]                # OOD label = K (last class)

    # Single packed store (one output stream) instead of per-column stores.
    ocol = lax.broadcasted_iota(jnp.int32, (tn, 4), 1)
    packed = jnp.where(ocol == 0, ce_kp1,
             jnp.where(ocol == 1, ce_k,
             jnp.where(ocol == 2, gnorm, ce_v)))
    out_ref[...] = packed


# ---------------------------------------------------------------------------
# pallas_call wrapper
# ---------------------------------------------------------------------------

_VMEM_LIMIT_BYTES = 32 * 1024 * 1024   # safe on v5e/v6e (128 MiB) and v7x (64 MiB)
_ROW_TILE_CAP = 1024                   # rows; big tiles amortize ~0.35 us/step
_X_TILE_BYTES = 8 * 1024 * 1024        # per-buffer x budget (double-buffered)


def _row_tile(n_rows, d):
    """Row tile: multiple of 8 (or the full batch), <= ~8 MiB of x per buffer,
    and >= 2 grid tiles once the batch is big enough so both v7x TensorCores
    get work under the 'parallel' N axis."""
    cap = max(8, min(_ROW_TILE_CAP, (_X_TILE_BYTES // (4 * d)) // 8 * 8))
    if n_rows <= 2 * cap:
        if n_rows >= 64:
            half = -(-n_rows // 2)                 # ceil(n/2)
            return min(cap, -(-half // 8) * 8)     # ceil to multiple of 8
        return n_rows                              # tiny batch: one full block
    return cap


def fused_dro_stats(x_flat, y, w, b, num_classes, epsilon):
    """x:[N,D], y:[N] int, w:[D,K+1], b:[K+1]
    -> [N, 4] = (ce_{K+1}, ce_K, ||dCE_K/dx||, ce_virtual_OOD)."""
    N, D = x_flat.shape
    C = w.shape[1]
    K = num_classes

    w32 = w.astype(jnp.float32)
    b2 = b.reshape(1, C).astype(jnp.float32)
    y2 = y.astype(jnp.int32).reshape(N, 1)
    # Tiny [K, K+1] matrix computed once in XLA: M = W_K^T @ W.
    # M[:, :K] is the Gram matrix for the gradient-norm quadratic form and the
    # full M maps K-space dlogits into (K+1)-space logit perturbations.
    M = jnp.dot(w32[:, :K].T, w32)

    tn = _row_tile(N, D)
    kernel = functools.partial(fused_dro_kernel,
                               num_classes=K, epsilon=float(epsilon))
    return pl.pallas_call(
        kernel,
        grid=(pl.cdiv(N, tn),),
        out_shape=jax.ShapeDtypeStruct((N, 4), jnp.float32),
        in_specs=[
            pl.BlockSpec((tn, D), lambda i: (i, 0)),   # x: row-tiled, read once
            pl.BlockSpec((tn, 1), lambda i: (i, 0)),   # labels (int32 column)
            pl.BlockSpec((D, C), lambda i: (0, 0)),    # w: resident
            pl.BlockSpec((1, C), lambda i: (0, 0)),    # b: resident
            pl.BlockSpec((K, C), lambda i: (0, 0)),    # M: resident
        ],
        out_specs=pl.BlockSpec((tn, 4), lambda i: (i, 0)),
        compiler_params=pltpu.CompilerParams(
            dimension_semantics=("parallel",),
            vmem_limit_bytes=_VMEM_LIMIT_BYTES),
    )(x_flat, y2, w32, b2, M)


# ---------------------------------------------------------------------------
# VirtualKPlusOneDRO forward (Pallas-backed)
# ---------------------------------------------------------------------------

def virtual_kplusone_dro_forward(x, y, w, b, *, num_classes,
                                 epsilon=0.1, virtual_ratio=0.3, alpha=0.5,
                                 perm_key=None):
    B = x.shape[0]
    D = int(np.prod(x.shape[1:]))
    K = num_classes
    x_flat = x.reshape(B, D).astype(jnp.float32)

    # Single fused pass over the whole batch: x is read from HBM once and only
    # four scalars per row come back.  Labels are assumed < K (in-distribution)
    # as in the PyTorch module.
    stats = fused_dro_stats(x_flat, y, w, b, K, epsilon)   # [B, 4]
    ce_kp1 = stats[:, 0]
    ce_k = stats[:, 1]
    grad_penalty = stats[:, 2]
    ce_virtual_all = stats[:, 3]

    virtual_size = int(B * virtual_ratio)
    if virtual_size > 0:
        # TODO(synk): torch.randperm draws fresh randomness every call; here we
        # use a deterministic jax.random.permutation with an explicit key.
        perm = jax.random.permutation(perm_key, B)
        vidx = perm[:virtual_size]
        ce_virtual = ce_virtual_all[vidx]   # V scalars; no second pass over x
        # Mean CE over the (implicit) concatenated batch [x, virtual_ood].
        k_plus_one_loss = (jnp.sum(ce_kp1) + jnp.sum(ce_virtual)) / (B + virtual_size)
    else:
        k_plus_one_loss = jnp.mean(ce_kp1)

    # DRO regularization: per-sample CE on first K logits + eps * ||grad_x||.
    dro_regularization = jnp.mean(ce_k + epsilon * grad_penalty)

    return k_plus_one_loss + alpha * dro_regularization


# ---------------------------------------------------------------------------
# Pure-JAX reference (uses jax.grad for the input gradients) for validation
# ---------------------------------------------------------------------------

def _ref_forward(x, y, w, b, *, num_classes, epsilon, virtual_ratio, alpha,
                 perm_key):
    B = x.shape[0]
    D = int(np.prod(x.shape[1:]))
    K = num_classes
    xf = x.reshape(B, D).astype(jnp.float32)
    wk, bk = w[:, :K], b[:K]

    def ce_k(xr, yi):
        return -jax.nn.log_softmax(xr @ wk + bk)[yi]

    def ce_full(xr, yi):
        return -jax.nn.log_softmax(xr @ w + b)[yi]

    ce = jax.vmap(ce_k)(xf, y)
    grads = jax.vmap(jax.grad(ce_k))(xf, y)
    gnorm = jnp.sqrt(jnp.sum(grads * grads, axis=-1))

    vs = int(B * virtual_ratio)
    if vs > 0:
        perm = jax.random.permutation(perm_key, B)
        vidx = perm[:vs]
        x_vb, y_vb = xf[vidx], y[vidx]
        g_vb = jax.vmap(jax.grad(ce_k))(x_vb, y_vb)
        gn_vb = jnp.sqrt(jnp.sum(g_vb * g_vb, axis=-1, keepdims=True))
        vood = x_vb + epsilon * g_vb / (gn_vb + 1e-8)
        x_comb = jnp.concatenate([xf, vood], axis=0)
        y_comb = jnp.concatenate([y, jnp.full((vs,), K, dtype=y.dtype)], axis=0)
    else:
        x_comb, y_comb = xf, y

    kp1 = jnp.mean(jax.vmap(ce_full)(x_comb, y_comb))
    dro = jnp.mean(ce + epsilon * gnorm)
    return kp1 + alpha * dro


# ---------------------------------------------------------------------------
# main
# ---------------------------------------------------------------------------

if __name__ == "__main__":
    key = jax.random.PRNGKey(0)
    kx, ky, kw, kb, kperm = jax.random.split(key, 5)

    B, C, H, W = 8, 4, 16, 16          # batch=8 so virtual_size = int(8*0.3) = 2
    K = 10                              # num_classes; classifier outputs K+1
    D = C * H * W

    x = jax.random.normal(kx, (B, C, H, W), dtype=jnp.float32)
    y = jax.random.randint(ky, (B,), 0, K, dtype=jnp.int32)

    # deterministic synthetic classifier parameters (linear D -> K+1)
    w = jax.random.normal(kw, (D, K + 1), dtype=jnp.float32) * 0.02
    b = jax.random.normal(kb, (K + 1,), dtype=jnp.float32) * 0.01

    loss = virtual_kplusone_dro_forward(
        x, y, w, b, num_classes=K, epsilon=0.1, virtual_ratio=0.3, alpha=0.5,
        perm_key=kperm)
    loss = jax.block_until_ready(loss)

    ref = jax.block_until_ready(_ref_forward(
        x, y, w, b, num_classes=K, epsilon=0.1, virtual_ratio=0.3, alpha=0.5,
        perm_key=kperm))

    assert jnp.isfinite(loss), loss
    assert jnp.allclose(loss, ref, rtol=1e-4, atol=1e-4), (loss, ref)
    print("KERNEL_OK")
</pallas_src>

<mosaic_0001>
module attributes {stable_mosaic.version = 11 : i64} {
  func.func @fused_dro_kernel(%arg0: i32, %arg1: memref<8x1024xf32, #tpu.memory_space<vmem>>, %arg2: memref<8x1xi32, #tpu.memory_space<vmem>>, %arg3: memref<1024x11xf32, #tpu.memory_space<vmem>>, %arg4: memref<1x11xf32, #tpu.memory_space<vmem>>, %arg5: memref<10x11xf32, #tpu.memory_space<vmem>>, %arg6: memref<8x4xf32, #tpu.memory_space<vmem>>) attributes {dimension_semantics = [#tpu.dimension_semantics<parallel>], iteration_bounds = array<i64: 1>, scalar_prefetch = 0 : i64, scratch_operands = 0 : i64, tpu.core_type = #tpu.core_type<tc>, window_params = [{transform_indices = @transform_0, window_bounds = array<i64: 8, 1024>}, {transform_indices = @transform_1, window_bounds = array<i64: 8, 1>}, {pipeline_mode = #tpu.pipeline_mode<synchronous>, transform_indices = @transform_2, window_bounds = array<i64: 1024, 11>}, {pipeline_mode = #tpu.pipeline_mode<synchronous>, transform_indices = @transform_3, window_bounds = array<i64: 1, 11>}, {pipeline_mode = #tpu.pipeline_mode<synchronous>, transform_indices = @transform_4, window_bounds = array<i64: 10, 11>}, {transform_indices = @transform_5, window_bounds = array<i64: 8, 4>}]} {
    %c0 = arith.constant 0 : index
    %c0_0 = arith.constant 0 : index
    %0 = vector.load %arg1[%c0, %c0_0] : memref<8x1024xf32, #tpu.memory_space<vmem>>, vector<8x1024xf32>
    %c0_1 = arith.constant 0 : index
    %c0_2 = arith.constant 0 : index
    %1 = vector.load %arg2[%c0_1, %c0_2] : memref<8x1xi32, #tpu.memory_space<vmem>>, vector<8x1xi32>
    %c0_3 = arith.constant 0 : index
    %c0_4 = arith.constant 0 : index
    %2 = vector.load %arg3[%c0_3, %c0_4] : memref<1024x11xf32, #tpu.memory_space<vmem>>, vector<1024x11xf32>
    %c0_5 = arith.constant 0 : index
    %c0_6 = arith.constant 0 : index
    %3 = vector.load %arg4[%c0_5, %c0_6] : memref<1x11xf32, #tpu.memory_space<vmem>>, vector<1x11xf32>
    %c0_7 = arith.constant 0 : index
    %c0_8 = arith.constant 0 : index
    %4 = vector.load %arg5[%c0_7, %c0_8] : memref<10x11xf32, #tpu.memory_space<vmem>>, vector<10x11xf32>
    %cst = arith.constant dense<0.000000e+00> : vector<8x11xf32>
    %5 = tpu.matmul %0, %2, %cst {dimension_numbers = #tpu.dot_dimension_numbers<[1], [0], [0], [1], [0, 0, 1, 1], [], []>} : vector<8x1024xf32>, vector<1024x11xf32>, vector<8x11xf32> -> vector<8x11xf32>
    %6 = vector.broadcast %3 : vector<1x11xf32> to vector<8x11xf32>
    %7 = arith.addf %5, %6 : vector<8x11xf32>
    %8 = tpu.iota {dimensions = array<i32: 1>} : vector<8x11xi32>
    %9 = vector.broadcast %1 : vector<8x1xi32> to vector<8x11xi32>
    %10 = arith.cmpi eq, %8, %9 : vector<8x11xi32>
    %cst_9 = arith.constant 1.000000e+00 : f32
    %cst_10 = arith.constant 0.000000e+00 : f32
    %11 = vector.broadcast %cst_9 : f32 to vector<8x11xf32>
    %12 = vector.broadcast %cst_10 : f32 to vector<8x11xf32>
    %13 = arith.select %10, %11, %12 : vector<8x11xi1>, vector<8x11xf32>
    %14 = arith.mulf %13, %7 : vector<8x11xf32>
    %cst_11 = arith.constant dense<0.000000e+00> : vector<8xf32>
    %15 = vector.multi_reduction <add>, %14, %cst_11 [1] : vector<8x11xf32> to vector<8xf32>
    %16 = vector.shape_cast %15 : vector<8xf32> to vector<8x1xf32>
    %cst_12 = arith.constant dense<0xFF800000> : vector<8xf32>
    %17 = vector.multi_reduction <maximumf>, %7, %cst_12 [1] : vector<8x11xf32> to vector<8xf32>
    %18 = vector.shape_cast %17 : vector<8xf32> to vector<8x1xf32>
    %19 = vector.broadcast %18 : vector<8x1xf32> to vector<8x11xf32>
    %20 = arith.subf %7, %19 : vector<8x11xf32>
    %21 = math.exp %20 : vector<8x11xf32>
    %cst_13 = arith.constant dense<0.000000e+00> : vector<8xf32>
    %22 = vector.multi_reduction <add>, %21, %cst_13 [1] : vector<8x11xf32> to vector<8xf32>
    %23 = vector.shape_cast %22 : vector<8xf32> to vector<8x1xf32>
    %24 = math.log %23 : vector<8x1xf32>
    %25 = arith.addf %18, %24 : vector<8x1xf32>
    %26 = arith.subf %25, %16 : vector<8x1xf32>
    %27 = vector.extract_strided_slice %7 {offsets = [0, 0], sizes = [8, 10], strides = [1, 1]} : vector<8x11xf32> to vector<8x10xf32>
    %cst_14 = arith.constant dense<0xFF800000> : vector<8xf32>
    %28 = vector.multi_reduction <maximumf>, %27, %cst_14 [1] : vector<8x10xf32> to vector<8xf32>
    %29 = vector.shape_cast %28 : vector<8xf32> to vector<8x1xf32>
    %30 = vector.broadcast %29 : vector<8x1xf32> to vector<8x10xf32>
    %31 = arith.subf %27, %30 : vector<8x10xf32>
    %32 = math.exp %31 : vector<8x10xf32>
    %cst_15 = arith.constant dense<0.000000e+00> : vector<8xf32>
    %33 = vector.multi_reduction <add>, %32, %cst_15 [1] : vector<8x10xf32> to vector<8xf32>
    %34 = vector.shape_cast %33 : vector<8xf32> to vector<8x1xf32>
    %35 = math.log %34 : vector<8x1xf32>
    %36 = arith.addf %29, %35 : vector<8x1xf32>
    %37 = arith.subf %36, %16 : vector<8x1xf32>
    %38 = vector.broadcast %36 : vector<8x1xf32> to vector<8x10xf32>
    %39 = arith.subf %27, %38 : vector<8x10xf32>
    %40 = math.exp %39 : vector<8x10xf32>
    %41 = vector.extract_strided_slice %13 {offsets = [0, 0], sizes = [8, 10], strides = [1, 1]} : vector<8x11xf32> to vector<8x10xf32>
    %42 = arith.subf %40, %41 : vector<8x10xf32>
    %cst_16 = arith.constant dense<0.000000e+00> : vector<8x11xf32>
    %43 = tpu.matmul %42, %4, %cst_16 {dimension_numbers = #tpu.dot_dimension_numbers<[1], [0], [0], [1], [0, 0, 1, 1], [], []>} : vector<8x10xf32>, vector<10x11xf32>, vector<8x11xf32> -> vector<8x11xf32>
    %44 = vector.extract_strided_slice %43 {offsets = [0, 0], sizes = [8, 10], strides = [1, 1]} : vector<8x11xf32> to vector<8x10xf32>
    %45 = arith.mulf %44, %42 : vector<8x10xf32>
    %cst_17 = arith.constant dense<0.000000e+00> : vector<8xf32>
    %46 = vector.multi_reduction <add>, %45, %cst_17 [1] : vector<8x10xf32> to vector<8xf32>
    %47 = vector.shape_cast %46 : vector<8xf32> to vector<8x1xf32>
    %cst_18 = arith.constant 0.000000e+00 : f32
    %48 = vector.broadcast %cst_18 : f32 to vector<8x1xf32>
    %49 = arith.maximumf %47, %48 : vector<8x1xf32>
    %50 = math.sqrt %49 : vector<8x1xf32>
    %cst_19 = arith.constant 9.99999993E-9 : f32
    %51 = vector.broadcast %cst_19 : f32 to vector<8x1xf32>
    %52 = arith.addf %50, %51 : vector<8x1xf32>
    %cst_20 = arith.constant 1.000000e-01 : f32
    %53 = vector.broadcast %cst_20 : f32 to vector<8x1xf32>
    %54 = arith.divf %53, %52 : vector<8x1xf32>
    %55 = vector.broadcast %54 : vector<8x1xf32> to vector<8x11xf32>
    %56 = arith.mulf %55, %43 : vector<8x11xf32>
    %57 = arith.addf %7, %56 : vector<8x11xf32>
    %cst_21 = arith.constant dense<0xFF800000> : vector<8xf32>
    %58 = vector.multi_reduction <maximumf>, %57, %cst_21 [1] : vector<8x11xf32> to vector<8xf32>
    %59 = vector.shape_cast %58 : vector<8xf32> to vector<8x1xf32>
    %60 = vector.broadcast %59 : vector<8x1xf32> to vector<8x11xf32>
    %61 = arith.subf %57, %60 : vector<8x11xf32>
    %62 = math.exp %61 : vector<8x11xf32>
    %cst_22 = arith.constant dense<0.000000e+00> : vector<8xf32>
    %63 = vector.multi_reduction <add>, %62, %cst_22 [1] : vector<8x11xf32> to vector<8xf32>
    %64 = vector.shape_cast %63 : vector<8xf32> to vector<8x1xf32>
    %65 = math.log %64 : vector<8x1xf32>
    %66 = arith.addf %59, %65 : vector<8x1xf32>
    %67 = vector.extract_strided_slice %57 {offsets = [0, 10], sizes = [8, 1], strides = [1, 1]} : vector<8x11xf32> to vector<8x1xf32>
    %68 = arith.subf %66, %67 : vector<8x1xf32>
    %69 = tpu.iota {dimensions = array<i32: 1>} : vector<8x4xi32>
    %c0_i32 = arith.constant 0 : i32
    %70 = vector.broadcast %c0_i32 : i32 to vector<8x4xi32>
    %71 = arith.cmpi eq, %69, %70 : vector<8x4xi32>
    %c1_i32 = arith.constant 1 : i32
    %72 = vector.broadcast %c1_i32 : i32 to vector<8x4xi32>
    %73 = arith.cmpi eq, %69, %72 : vector<8x4xi32>
    %c2_i32 = arith.constant 2 : i32
    %74 = vector.broadcast %c2_i32 : i32 to vector<8x4xi32>
    %75 = arith.cmpi eq, %69, %74 : vector<8x4xi32>
    %76 = vector.shape_cast %50 : vector<8x1xf32> to vector<8x1xf32>
    %77 = vector.broadcast %76 : vector<8x1xf32> to vector<8x4xf32>
    %78 = vector.shape_cast %68 : vector<8x1xf32> to vector<8x1xf32>
    %79 = vector.broadcast %78 : vector<8x1xf32> to vector<8x4xf32>
    %80 = arith.select %75, %77, %79 : vector<8x4xi1>, vector<8x4xf32>
    %81 = vector.shape_cast %37 : vector<8x1xf32> to vector<8x1xf32>
    %82 = vector.broadcast %81 : vector<8x1xf32> to vector<8x4xf32>
    %83 = arith.select %73, %82, %80 : vector<8x4xi1>, vector<8x4xf32>
    %84 = vector.shape_cast %26 : vector<8x1xf32> to vector<8x1xf32>
    %85 = vector.broadcast %84 : vector<8x1xf32> to vector<8x4xf32>
    %86 = arith.select %71, %85, %83 : vector<8x4xi1>, vector<8x4xf32>
    %c0_23 = arith.constant 0 : index
    %c0_24 = arith.constant 0 : index
    %87 = vector.load %arg6[%c0_23, %c0_24] : memref<8x4xf32, #tpu.memory_space<vmem>>, vector<8x4xf32>
    tpu.vector_store %arg6[%c0_23, %c0_24], %86 {strides = array<i32>} : memref<8x4xf32, #tpu.memory_space<vmem>>, vector<8x4xf32>,
    return
  }
  func.func @transform_0(%arg0: i32) -> (i32, i32) {
    %c0_i32 = arith.constant 0 : i32
    %c0_i32_0 = arith.constant 0 : i32
    return %arg0, %c0_i32 : i32, i32
  }
  func.func @transform_1(%arg0: i32) -> (i32, i32) {
    %c0_i32 = arith.constant 0 : i32
    %c0_i32_0 = arith.constant 0 : i32
    return %arg0, %c0_i32 : i32, i32
  }
  func.func @transform_2(%arg0: i32) -> (i32, i32) {
    %c0_i32 = arith.constant 0 : i32
    %c0_i32_0 = arith.constant 0 : i32
    %c0_i32_1 = arith.constant 0 : i32
    return %c0_i32, %c0_i32_0 : i32, i32
  }
  func.func @transform_3(%arg0: i32) -> (i32, i32) {
    %c0_i32 = arith.constant 0 : i32
    %c0_i32_0 = arith.constant 0 : i32
    %c0_i32_1 = arith.constant 0 : i32
    return %c0_i32, %c0_i32_0 : i32, i32
  }
  func.func @transform_4(%arg0: i32) -> (i32, i32) {
    %c0_i32 = arith.constant 0 : i32
    %c0_i32_0 = arith.constant 0 : i32
    %c0_i32_1 = arith.constant 0 : i32
    return %c0_i32, %c0_i32_0 : i32, i32
  }
  func.func @transform_5(%arg0: i32) -> (i32, i32) {
    %c0_i32 = arith.constant 0 : i32
    %c0_i32_0 = arith.constant 0 : i32
    return %arg0, %c0_i32 : i32, i32
  }
}

</mosaic_0001>

<bundles_post_ra>
// kernel: tpu_custom_call.1
= control target key start
LH: loop header
LB: loop body
LE: loop exit
PB: predicated region body
PF: predicated region fallthrough
CT: control target
= control target key end

     0   :  { %v924_v3 = vmov 0   ;;  %vm471_vm0 = vcmask 80896   ;;  %vm492_vm1 = vcmask 1041408   ;;  %vm926_vm2 = vmmov 1   ;;  %s1411_s2 = inlined_call_operand.vmem [shape: f32[1024,11], index: 2, kind: input, shape index: {}]   ;;  %s1412_s0 = inlined_call_operand.vmem [shape: f32[8,1024], index: 0, kind: input, shape index: {}]   ;;  %s1413_s1 = inlined_call_operand.vmem [shape: s32[8,1], index: 1, kind: input, shape index: {}]   ;;  %s1414_s3 = inlined_call_operand.vmem [shape: f32[1,11], index: 3, kind: input, shape index: {}]   ;;  %s1415_s4 = inlined_call_operand.vmem [shape: f32[10,11], index: 4, kind: input, shape index: {}]   ;;  %s1416_s5 = inlined_call_operand.vmem [shape: f32[8,4], index: 5, kind: output, shape index: {}]  }
   0x1   :  { %v45_v0 = vld [vmem:[%s1411_s2 + $0x80] sm:$0xff]  ;;  %v46_v1 = vld [vmem:[%s1411_s2 + $0x88] sm:$0xff]  ;;  %904 = vset.pattern.permute.xlu1 %v924_v3  ;;  %v47_v12 = vld [vmem:[%s1411_s2 + $0x90] sm:$0xff]  ;;  %vm927_vm4 = vmmov 0   ;;  %vm454_vm8 = vcmask 89088   ;;  %vm607_vm12 = vcmask 31744  }
   0x2   :  { %v29_v2 = vld [vmem:[%s1411_s2] sm:$0xff]  ;;  %v766_v4 = vpack.c.bf16 %v46_v1, %v45_v0  ;;  %v30_v5 = vld [vmem:[%s1411_s2 + $0x8] sm:$0xff]  ;;  %v48_v14 = vld [vmem:[%s1411_s2 + $0x98] sm:$0xff] }
   0x3   :  { %v77_v6 = vld [vmem:[%s1411_s2 + $0x180] sm:$0xff]  ;;  %v78_v7 = vld [vmem:[%s1411_s2 + $0x188] sm:$0xff]  ;;  %v768_v8 = vpack.c.bf16 %v30_v5, %v29_v2  ;;  %v31_v15 = vld [vmem:[%s1411_s2 + $0x10] sm:$0xff]  ;;  %v770_v17 = vpack.c.bf16 %v48_v14, %v47_v12 }
   0x4   :  { %v798_v9 = vpack.c.bf16 %v78_v7, %v77_v6  ;;  %v61_v10 = vld [vmem:[%s1411_s2 + $0x100] sm:$0xff]  ;;  %v62_v11 = vld [vmem:[%s1411_s2 + $0x108] sm:$0xff]  ;;  %767 = vmatprep.subr.bf16.mxu0 %v766_v4  ;;  %v32_v16 = vld [vmem:[%s1411_s2 + $0x18] sm:$0xff] }
   0x5   :  { %v800_v13 = vpack.c.bf16 %v62_v11, %v61_v10  ;;  %769 = vmatpush3.bf16.msra.mxu0 %v768_v8  ;;  %v772_v18 = vpack.c.bf16 %v32_v16, %v31_v15  ;;  %v79_v19 = vld [vmem:[%s1411_s2 + $0x190] sm:$0xff]  ;;  %v80_v20 = vld [vmem:[%s1411_s2 + $0x198] sm:$0xff]  ;;  %v49_v24 = vld [vmem:[%s1411_s2 + $0xa0] sm:$0xff] }
   0x6   :  { %799 = vmatprep.subr.bf16.mxu1 %v798_v9  ;;  %v63_v21 = vld [vmem:[%s1411_s2 + $0x110] sm:$0xff]  ;;  %v802_v22 = vpack.c.bf16 %v80_v20, %v79_v19  ;;  %v64_v23 = vld [vmem:[%s1411_s2 + $0x118] sm:$0xff]  ;;  %v50_v25 = vld [vmem:[%s1411_s2 + $0xa8] sm:$0xff]  ;;  %771 = vmatprep.subr.bf16.mxu0 %v770_v17 }
   0x7   :  { %801 = vmatpush3.bf16.msra.mxu1 %v800_v13  ;;  %v804_v26 = vpack.c.bf16 %v64_v23, %v63_v21  ;;  %v774_v27 = vpack.c.bf16 %v50_v25, %v49_v24  ;;  %v33_v28 = vld [vmem:[%s1411_s2 + $0x20] sm:$0xff]  ;;  %v34_v29 = vld [vmem:[%s1411_s2 + $0x28] sm:$0xff]  ;;  %v51_v36 = vld [vmem:[%s1411_s2 + $0xb0] sm:$0xff] }
   0x8   :  { %v81_v30 = vld [vmem:[%s1411_s2 + $0x1a0] sm:$0xff]  ;;  %803 = vmatprep.subr.bf16.mxu1 %v802_v22  ;;  %v82_v31 = vld [vmem:[%s1411_s2 + $0x1a8] sm:$0xff]  ;;  %v776_v34 = vpack.c.bf16 %v34_v29, %v33_v28  ;;  %v52_v37 = vld [vmem:[%s1411_s2 + $0xb8] sm:$0xff] }
   0x9   :  { %v65_v32 = vld [vmem:[%s1411_s2 + $0x120] sm:$0xff]  ;;  %v66_v33 = vld [vmem:[%s1411_s2 + $0x128] sm:$0xff]  ;;  %773 = vmatpush3.bf16.msra.mxu0 %v772_v18  ;;  %v806_v35 = vpack.c.bf16 %v82_v31, %v81_v30  ;;  %v35_v38 = vld [vmem:[%s1411_s2 + $0x30] sm:$0xff]  ;;  %v778_v40 = vpack.c.bf16 %v52_v37, %v51_v36 }
   0xa   :  { %775 = vmatprep.subr.bf16.mxu0 %v774_v27  ;;  %v808_v39 = vpack.c.bf16 %v66_v33, %v65_v32  ;;  %v36_v41 = vld [vmem:[%s1411_s2 + $0x38] sm:$0xff]  ;;  %v83_v42 = vld [vmem:[%s1411_s2 + $0x1b0] sm:$0xff]  ;;  %v53_v47 = vld [vmem:[%s1411_s2 + $0xc0] sm:$0xff] }
   0xb   :  { %805 = vmatpush3.bf16.msra.mxu1 %v804_v26  ;;  %v84_v43 = vld [vmem:[%s1411_s2 + $0x1b8] sm:$0xff]  ;;  %v67_v45 = vld [vmem:[%s1411_s2 + $0x130] sm:$0xff]  ;;  %v54_v48 = vld [vmem:[%s1411_s2 + $0xc8] sm:$0xff]  ;;  %v780_v49 = vpack.c.bf16 %v36_v41, %v35_v38 }
   0xc   :  { %807 = vmatprep.subr.bf16.mxu1 %v806_v35  ;;  %v810_v44 = vpack.c.bf16 %v84_v43, %v83_v42  ;;  %v68_v46 = vld [vmem:[%s1411_s2 + $0x138] sm:$0xff]  ;;  %v85_v50 = vld [vmem:[%s1411_s2 + $0x1c0] sm:$0xff]  ;;  %v86_v51 = vld [vmem:[%s1411_s2 + $0x1c8] sm:$0xff]  ;;  %v782_v53 = vpack.c.bf16 %v54_v48, %v53_v47 }
   0xd   :  { %777 = vmatpush3.bf16.msra.mxu0 %v776_v34  ;;  %v812_v52 = vpack.c.bf16 %v68_v46, %v67_v45  ;;  %v37_v54 = vld [vmem:[%s1411_s2 + $0x40] sm:$0xff]  ;;  %v38_v55 = vld [vmem:[%s1411_s2 + $0x48] sm:$0xff]  ;;  %v814_v57 = vpack.c.bf16 %v86_v51, %v85_v50  ;;  %v55_v59 = vld [vmem:[%s1411_s2 + $0xd0] sm:$0xff] }
   0xe   :  { %779 = vmatprep.subr.bf16.mxu0 %v778_v40  ;;  %v69_v56 = vld [vmem:[%s1411_s2 + $0x140] sm:$0xff]  ;;  %v70_v58 = vld [vmem:[%s1411_s2 + $0x148] sm:$0xff]  ;;  %v56_v60 = vld [vmem:[%s1411_s2 + $0xd8] sm:$0xff]  ;;  %v784_v63 = vpack.c.bf16 %v38_v55, %v37_v54 }
   0xf   :  { %809 = vmatpush3.bf16.msra.mxu1 %v808_v39  ;;  %v87_v61 = vld [vmem:[%s1411_s2 + $0x1d0] sm:$0xff]  ;;  %v88_v62 = vld [vmem:[%s1411_s2 + $0x1d8] sm:$0xff]  ;;  %v816_v0 = vpack.c.bf16 %v70_v58, %v69_v56  ;;  %v786_v1 = vpack.c.bf16 %v56_v60, %v55_v59  ;;  %v57_v7 = vld [vmem:[%s1411_s2 + $0xe0] sm:$0xff] }
  0x10   :  { %811 = vmatprep.subr.bf16.mxu1 %v810_v44  ;;  %v39_v2 = vld [vmem:[%s1411_s2 + $0x50] sm:$0xff]  ;;  %v40_v3 = vld [vmem:[%s1411_s2 + $0x58] sm:$0xff]  ;;  %v818_v5 = vpack.c.bf16 %v88_v62, %v87_v61  ;;  %v58_v8 = vld [vmem:[%s1411_s2 + $0xe8] sm:$0xff] }
  0x11   :  { %781 = vmatpush3.bf16.msra.mxu0 %v780_v49  ;;  %v71_v4 = vld [vmem:[%s1411_s2 + $0x150] sm:$0xff]  ;;  %v72_v6 = vld [vmem:[%s1411_s2 + $0x158] sm:$0xff]  ;;  %v89_v9 = vld [vmem:[%s1411_s2 + $0x1e0] sm:$0xff]  ;;  %v788_v11 = vpack.c.bf16 %v40_v3, %v39_v2  ;;  %v790_v15 = vpack.c.bf16 %v58_v8, %v57_v7 }
  0x12   :  { %783 = vmatprep.subr.bf16.mxu0 %v782_v53  ;;  %v90_v10 = vld [vmem:[%s1411_s2 + $0x1e8] sm:$0xff]  ;;  %v41_v12 = vld [vmem:[%s1411_s2 + $0x60] sm:$0xff]  ;;  %v820_v14 = vpack.c.bf16 %v72_v6, %v71_v4  ;;  %v59_v20 = vld [vmem:[%s1411_s2 + $0xf0] sm:$0xff] }
  0x13   :  { %813 = vmatpush3.bf16.msra.mxu1 %v812_v52  ;;  %v42_v13 = vld [vmem:[%s1411_s2 + $0x68] sm:$0xff]  ;;  %v73_v16 = vld [vmem:[%s1411_s2 + $0x160] sm:$0xff]  ;;  %v822_v19 = vpack.c.bf16 %v90_v10, %v89_v9  ;;  %v60_v21 = vld [vmem:[%s1411_s2 + $0xf8] sm:$0xff] }
  0x14   :  { %815 = vmatprep.subr.bf16.mxu1 %v814_v57  ;;  %v74_v17 = vld [vmem:[%s1411_s2 + $0x168] sm:$0xff]  ;;  %v23_v22 = vld [vmem:[%s1412_s0 + $0x18] sm:$0xff]  ;;  %v91_v23 = vld [vmem:[%s1411_s2 + $0x1f0] sm:$0xff]  ;;  %v792_v25 = vpack.c.bf16 %v42_v13, %v41_v12  ;;  %v794_v27 = vpack.c.bf16 %v60_v21, %v59_v20 }
  0x15   :  { %785 = vmatpush3.bf16.msra.mxu0 %v784_v63  ;;  %v21_v18 = vld [vmem:[%s1412_s0 + $0x8] sm:$0xff]  ;;  %v92_v24 = vld [vmem:[%s1411_s2 + $0x1f8] sm:$0xff]  ;;  %300 = vmatprep.mubr.f32.mxu1 %v23_v22  ;;  %v824_v26 = vpack.c.bf16 %v74_v17, %v73_v16  ;;  %v43_v28 = vld [vmem:[%s1411_s2 + $0x70] sm:$0xff] }
  0x16   :  { %787 = vmatprep.subr.bf16.mxu0 %v786_v1  ;;  %230 = vmatprep.mubr.f32.mxu0 %v21_v18  ;;  %v44_v29 = vld [vmem:[%s1411_s2 + $0x78] sm:$0xff]  ;;  %v75_v30 = vld [vmem:[%s1411_s2 + $0x170] sm:$0xff]  ;;  %v826_v31 = vpack.c.bf16 %v92_v24, %v91_v23  ;;  %v109_v33 = vld [vmem:[%s1411_s2 + $0x280] sm:$0xff] }
  0x17   :  { %817 = vmatpush3.bf16.msra.mxu1 %v816_v0  ;;  %v76_v32 = vld [vmem:[%s1411_s2 + $0x178] sm:$0xff]  ;;  %v110_v34 = vld [vmem:[%s1411_s2 + $0x288] sm:$0xff]  ;;  %v141_v35 = vld [vmem:[%s1411_s2 + $0x380] sm:$0xff]  ;;  %v796_v37 = vpack.c.bf16 %v44_v29, %v43_v28 }
  0x18   :  { %819 = vmatprep.subr.bf16.mxu1 %v818_v5  ;;  %v142_v36 = vld [vmem:[%s1411_s2 + $0x388] sm:$0xff]  ;;  %v828_v38 = vpack.c.bf16 %v76_v32, %v75_v30  ;;  %v830_v39 = vpack.c.bf16 %v110_v34, %v109_v33  ;;  %v93_v40 = vld [vmem:[%s1411_s2 + $0x200] sm:$0xff]  ;;  %v111_v45 = vld [vmem:[%s1411_s2 + $0x290] sm:$0xff] }
  0x19   :  { %789 = vmatpush3.bf16.msra.mxu0 %v788_v11  ;;  %v94_v41 = vld [vmem:[%s1411_s2 + $0x208] sm:$0xff]  ;;  %v125_v42 = vld [vmem:[%s1411_s2 + $0x300] sm:$0xff]  ;;  %v862_v43 = vpack.c.bf16 %v142_v36, %v141_v35  ;;  %v112_v46 = vld [vmem:[%s1411_s2 + $0x298] sm:$0xff] }
  0x1a   :  { %791 = vmatprep.subr.bf16.mxu0 %v790_v15  ;;  %v126_v44 = vld [vmem:[%s1411_s2 + $0x308] sm:$0xff]  ;;  %v143_v47 = vld [vmem:[%s1411_s2 + $0x390] sm:$0xff]  ;;  %v144_v48 = vld [vmem:[%s1411_s2 + $0x398] sm:$0xff]  ;;  %v832_v50 = vpack.c.bf16 %v94_v41, %v93_v40  ;;  %v834_v53 = vpack.c.bf16 %v112_v46, %v111_v45 }
  0x1b   :  { %821 = vmatpush3.bf16.msra.mxu1 %v820_v14  ;;  %v20_v49 = vld [vmem:[%s1412_s0] sm:$0xff]  ;;  %v22_v51 = vld [vmem:[%s1412_s0 + $0x10] sm:$0xff]  ;;  %v864_v52 = vpack.c.bf16 %v126_v44, %v125_v42  ;;  %v96_v55 = vld [vmem:[%s1411_s2 + $0x218] sm:$0xff]  ;;  %v866_v57 = vpack.c.bf16 %v144_v48, %v143_v47 }
  0x1c   :  { %823 = vmatprep.subr.bf16.mxu1 %v822_v19  ;;  %v95_v54 = vld [vmem:[%s1411_s2 + $0x210] sm:$0xff]  ;;  %v128_v58 = vld [vmem:[%s1411_s2 + $0x318] sm:$0xff]  ;;  %v113_v59 = vld [vmem:[%s1411_s2 + $0x2a0] sm:$0xff] }
  0x1d   :  { %793 = vmatpush3.bf16.msra.mxu0 %v792_v25  ;;  %v127_v56 = vld [vmem:[%s1411_s2 + $0x310] sm:$0xff]  ;;  %v114_v60 = vld [vmem:[%s1411_s2 + $0x2a8] sm:$0xff]  ;;  %v145_v61 = vld [vmem:[%s1411_s2 + $0x3a0] sm:$0xff]  ;;  %v836_v63 = vpack.c.bf16 %v96_v55, %v95_v54 }
  0x1e   :  { %795 = vmatprep.subr.bf16.mxu0 %v794_v27  ;;  %v146_v62 = vld [vmem:[%s1411_s2 + $0x3a8] sm:$0xff]  ;;  %v868_v0 = vpack.c.bf16 %v128_v58, %v127_v56  ;;  %v838_v1 = vpack.c.bf16 %v114_v60, %v113_v59  ;;  %v97_v2 = vld [vmem:[%s1411_s2 + $0x220] sm:$0xff]  ;;  %v115_v7 = vld [vmem:[%s1411_s2 + $0x2b0] sm:$0xff] }
  0x1f   :  { %825 = vmatpush3.bf16.msra.mxu1 %v824_v26  ;;  %v98_v3 = vld [vmem:[%s1411_s2 + $0x228] sm:$0xff]  ;;  %v129_v4 = vld [vmem:[%s1411_s2 + $0x320] sm:$0xff]  ;;  %v870_v5 = vpack.c.bf16 %v146_v62, %v145_v61  ;;  %v116_v8 = vld [vmem:[%s1411_s2 + $0x2b8] sm:$0xff] }
  0x20   :  { %827 = vmatprep.subr.bf16.mxu1 %v826_v31  ;;  %v130_v6 = vld [vmem:[%s1411_s2 + $0x328] sm:$0xff]  ;;  %v147_v9 = vld [vmem:[%s1411_s2 + $0x3b0] sm:$0xff]  ;;  %v148_v10 = vld [vmem:[%s1411_s2 + $0x3b8] sm:$0xff]  ;;  %v840_v11 = vpack.c.bf16 %v98_v3, %v97_v2  ;;  %v842_v13 = vpack.c.bf16 %v116_v8, %v115_v7 }
  0x21   :  { %797 = vmatpush3.bf16.msra.mxu0 %v796_v37  ;;  %v872_v12 = vpack.c.bf16 %v130_v6, %v129_v4  ;;  %v99_v14 = vld [vmem:[%s1411_s2 + $0x230] sm:$0xff]  ;;  %v100_v15 = vld [vmem:[%s1411_s2 + $0x238] sm:$0xff]  ;;  %v874_v17 = vpack.c.bf16 %v148_v10, %v147_v9  ;;  %v117_v19 = vld [vmem:[%s1411_s2 + $0x2c0] sm:$0xff] }
  0x22   :  { %831 = vmatprep.subr.bf16.mxu0 %v830_v39  ;;  %v131_v16 = vld [vmem:[%s1411_s2 + $0x330] sm:$0xff]  ;;  %v132_v18 = vld [vmem:[%s1411_s2 + $0x338] sm:$0xff]  ;;  %v118_v20 = vld [vmem:[%s1411_s2 + $0x2c8] sm:$0xff]  ;;  %v844_v23 = vpack.c.bf16 %v100_v15, %v99_v14 }
  0x23   :  { %829 = vmatpush3.bf16.msra.mxu1 %v828_v38  ;;  %v149_v21 = vld [vmem:[%s1411_s2 + $0x3c0] sm:$0xff]  ;;  %v150_v22 = vld [vmem:[%s1411_s2 + $0x3c8] sm:$0xff]  ;;  %v27_v26 = vld [vmem:[%s1412_s0 + $0x38] sm:$0xff]  ;;  %v876_v27 = vpack.c.bf16 %v132_v18, %v131_v16  ;;  %v846_v28 = vpack.c.bf16 %v118_v20, %v117_v19 }
  0x24   :  { %863 = vmatprep.subr.bf16.mxu1 %v862_v43  ;;  %231 = vmatmul.mubr.f32.vlgmr.msra.gmra.mrb[0].mxu0 %v20_v49  ;;  %v101_v24 = vld [vmem:[%s1411_s2 + $0x240] sm:$0xff]  ;;  %v25_v25 = vld [vmem:[%s1412_s0 + $0x28] sm:$0xff]  ;;  %v878_v32 = vpack.c.bf16 %v150_v22, %v149_v21  ;;  %v119_v34 = vld [vmem:[%s1411_s2 + $0x2d0] sm:$0xff] }
  0x25   :  { %833 = vmatpush3.bf16.msra.mxu0 %v832_v50  ;;  %v102_v29 = vld [vmem:[%s1411_s2 + $0x248] sm:$0xff]  ;;  %v133_v30 = vld [vmem:[%s1411_s2 + $0x340] sm:$0xff]  ;;  %v120_v35 = vld [vmem:[%s1411_s2 + $0x2d8] sm:$0xff]  ;;  %370 = vmatprep.mubr.f32.mxu0 %v25_v25 }
  0x26   :  { %301 = vmatmul.mubr.f32.vlgmr.msra.gmra.mrb[0].mxu1 %v22_v51  ;;  %835 = vmatprep.subr.bf16.mxu0 %v834_v53  ;;  %v28_v31 = vld [vmem:[%s1413_s1] sm:$0xff]  ;;  %v134_v33 = vld [vmem:[%s1411_s2 + $0x348] sm:$0xff]  ;;  %v151_v36 = vld [vmem:[%s1411_s2 + $0x3d0] sm:$0xff]  ;;  %v848_v38 = vpack.c.bf16 %v102_v29, %v101_v24  ;;  %v850_v40 = vpack.c.bf16 %v120_v35, %v119_v34 }
  0x27   :  { %865 = vmatpush3.bf16.msra.mxu1 %v864_v52  ;;  %v152_v37 = vld [vmem:[%s1411_s2 + $0x3d8] sm:$0xff]  ;;  %440 = vmatprep.mubr.f32.mxu1 %v27_v26  ;;  %v880_v39 = vpack.c.bf16 %v134_v33, %v133_v30  ;;  %v103_v41 = vld [vmem:[%s1411_s2 + $0x250] sm:$0xff]  ;;  %v121_v46 = vld [vmem:[%s1411_s2 + $0x2e0] sm:$0xff]  ;;  %v925_v33 = vmov 0.0|0.0  }
  0x28   :  { %867 = vmatprep.subr.bf16.mxu1 %v866_v57  ;;  %449 = vperm.xlu1 %904, %v28_v31   ;;  %v104_v42 = vld [vmem:[%s1411_s2 + $0x258] sm:$0xff]  ;;  %v135_v43 = vld [vmem:[%s1411_s2 + $0x350] sm:$0xff]  ;;  %v882_v44 = vpack.c.bf16 %v152_v37, %v151_v36  ;;  %v122_v47 = vld [vmem:[%s1411_s2 + $0x2e8] sm:$0xff]  ;;  %v928_v36 = vmov 0.0  }
  0x29   :  { %837 = vmatpush3.bf16.msra.mxu0 %v836_v63  ;;  %v136_v45 = vld [vmem:[%s1411_s2 + $0x358] sm:$0xff]  ;;  %v153_v48 = vld [vmem:[%s1411_s2 + $0x3e0] sm:$0xff]  ;;  %v154_v49 = vld [vmem:[%s1411_s2 + $0x3e8] sm:$0xff]  ;;  %v852_v50 = vpack.c.bf16 %v104_v42, %v103_v41  ;;  %v854_v52 = vpack.c.bf16 %v122_v47, %v121_v46 }
  0x2a   :  { %839 = vmatprep.subr.bf16.mxu0 %v838_v1  ;;  %v884_v51 = vpack.c.bf16 %v136_v45, %v135_v43  ;;  %v105_v53 = vld [vmem:[%s1411_s2 + $0x260] sm:$0xff]  ;;  %v106_v54 = vld [vmem:[%s1411_s2 + $0x268] sm:$0xff]  ;;  %v886_v56 = vpack.c.bf16 %v154_v49, %v153_v48  ;;  %v123_v58 = vld [vmem:[%s1411_s2 + $0x2f0] sm:$0xff] }
  0x2b   :  { %869 = vmatpush3.bf16.msra.mxu1 %v868_v0  ;;  %v137_v55 = vld [vmem:[%s1411_s2 + $0x360] sm:$0xff]  ;;  %v138_v57 = vld [vmem:[%s1411_s2 + $0x368] sm:$0xff]  ;;  %v124_v59 = vld [vmem:[%s1411_s2 + $0x2f8] sm:$0xff]  ;;  %v856_v62 = vpack.c.bf16 %v106_v54, %v105_v53 }
  0x2c   :  { %871 = vmatprep.subr.bf16.mxu1 %v870_v5  ;;  %v155_v60 = vld [vmem:[%s1411_s2 + $0x3f0] sm:$0xff]  ;;  %v156_v61 = vld [vmem:[%s1411_s2 + $0x3f8] sm:$0xff]  ;;  %v888_v63 = vpack.c.bf16 %v138_v57, %v137_v55  ;;  %v858_v0 = vpack.c.bf16 %v124_v59, %v123_v58  ;;  %v24_v8 = vld [vmem:[%s1412_s0 + $0x20] sm:$0xff] }
  0x2d   :  { %841 = vmatpush3.bf16.msra.mxu0 %v840_v11  ;;  %v107_v1 = vld [vmem:[%s1411_s2 + $0x270] sm:$0xff]  ;;  %v108_v2 = vld [vmem:[%s1411_s2 + $0x278] sm:$0xff]  ;;  %v890_v3 = vpack.c.bf16 %v156_v61, %v155_v60  ;;  %v613_v11 = vld [vmem:[%s1414_s3] ss:$0 sm:$0xff] }
  0x2e   :  { %843 = vmatprep.subr.bf16.mxu0 %v842_v13  ;;  %v139_v4 = vld [vmem:[%s1411_s2 + $0x370] sm:$0xff]  ;;  %v140_v5 = vld [vmem:[%s1411_s2 + $0x378] sm:$0xff]  ;;  %v860_v6 = vpack.c.bf16 %v108_v2, %v107_v1  ;;  %v158_v34 = vld [vmem:[%s1415_s4] sm:$0xff] }
  0x2f   :  { %873 = vmatpush3.bf16.msra.mxu1 %v872_v12  ;;  %v892_v7 = vpack.c.bf16 %v140_v5, %v139_v4  ;;  %v26_v9 = vld [vmem:[%s1412_s0 + $0x30] sm:$0xff]  ;;  %v159_v35 = vld [vmem:[%s1415_s4 + $0x8] sm:$0x3]  ;;  %vm896_vm3 = vmpackc.low %vm492_vm1, %vm926_vm2 }
  0x30   :  { %875 = vmatprep.subr.bf16.mxu1 %v874_v17  ;;  %v895_v37 = vpack.c.bf16 %v159_v35, %v158_v34 }
  0x31   :  { %845 = vmatpush3.bf16.msra.mxu0 %v844_v23 }
  0x32   :  { %847 = vmatprep.subr.bf16.mxu0 %v846_v28 }
  0x33   :  { %877 = vmatpush3.bf16.msra.mxu1 %v876_v27 }
  0x34   :  { %879 = vmatprep.subr.bf16.mxu1 %v878_v32 }
  0x35   :  { %849 = vmatpush3.bf16.msra.mxu0 %v848_v38 }
  0x36   :  { %851 = vmatprep.subr.bf16.mxu0 %v850_v40 }
  0x37   :  { %881 = vmatpush3.bf16.msra.mxu1 %v880_v39 }
  0x38   :  { %883 = vmatprep.subr.bf16.mxu1 %v882_v44  ;;  %v446_v44 = vlaneseq }
  0x39   :  { %853 = vmatpush3.bf16.msra.mxu0 %v852_v50 }
  0x3a   :  { %855 = vmatprep.subr.bf16.mxu0 %v854_v52  ;;  %v1390_v45 = vand.u32 127, %v446_v44 }
  0x3b   :  { %885 = vmatpush3.bf16.msra.mxu1 %v884_v51 }
  0x3c   :  { %887 = vmatprep.subr.bf16.mxu1 %v886_v56  ;;  %vm598_vm9 = vcmp.eq.s32.totalorder %v1390_v45, 2  ;;  %vm597_vm10 = vcmp.eq.s32.totalorder %v1390_v45, 1  ;;  %vm596_vm11 = vcmp.eq.s32.totalorder %v1390_v45, 0 }
  0x3d   :  { %857 = vmatpush3.bf16.msra.mxu0 %v856_v62 }
  0x3e   :  { %859 = vmatprep.subr.bf16.mxu0 %v858_v0 }
  0x3f   :  { %889 = vmatpush3.bf16.msra.mxu1 %v888_v63 }
  0x40   :  { %891 = vmatprep.subr.bf16.mxu1 %v890_v3 }
  0x41   :  { %861 = vmatpush3.bf16.msra.mxu0 %v860_v6 }
  0x42   :  { %894 = vmatprep.subr.bf16.mxu0 %v925_v33 }
  0x43   :  { %893 = vmatpush3.bf16.msra.mxu1 %v892_v7 }
  0x44   :  { %371 = vmatmul.mubr.f32.vlgmr.msra.gmra.mrb[2].mxu0 %v24_v8 }
  0x45   :  { %763 = vmatprep.mubr.msk.f32.mxu0 %vm927_vm4, %v928_v36  ;;  %897 = vmatpush3.bf16.msk.msra.mxu0 %vm896_vm3, %v895_v37 }
  0x46   :  { %441 = vmatmul.mubr.f32.vlgmr.msra.gmra.mrb[2].mxu1 %v26_v9 }
  0xa7   :  { %v450_v46 = vpop.permute.xlu1 %449 }
  0xa8   :  { %vm451_vm5 = vcmp.eq.s32.totalorder %v1390_v45, %v450_v46 }
  0xa9   :  { %v452_v48 = vsel %vm451_vm5, 1.0, %v928_v36 }
  0xf7   :  { %v648_v10 = vpop.f32.mrb[0].mxu0 }
  0xf8   :  { %v649_v12 = vpop.f32.mrb[1].mxu0 }
  0xf9   :  { %v683_v13 = vpop.f32.mrb[0].mxu1  ;;  %v650_v14 = vadd.f32 %v649_v12, %v648_v10 }
  0xfa   :  { %v684_v15 = vpop.f32.mrb[1].mxu1 }
  0xfb   :  { %v685_v16 = vadd.f32 %v684_v15, %v683_v13  ;;  %v233_v17 = vadd.f32 %v650_v14, %v613_v11 }
  0xfd   :  { %v303_v18 = vadd.f32 %v685_v16, %v233_v17  ;;  %v929_v16 = vmov 10  }
  0xfe   :  { %905 = vset.pattern.permute.xlu0 %v929_v16 }
 0x117   :  { %v718_v19 = vpop.f32.mrb[2].mxu0 }
 0x118   :  { %v719_v20 = vpop.f32.mrb[3].mxu0 }
 0x119   :  { %v753_v21 = vpop.f32.mrb[2].mxu1  ;;  %v720_v22 = vadd.f32 %v719_v20, %v718_v19 }
 0x11a   :  { %v754_v23 = vpop.f32.mrb[3].mxu1 }
 0x11b   :  { %v755_v24 = vadd.f32 %v754_v23, %v753_v21  ;;  %v373_v25 = vadd.f32 %v720_v22, %v303_v18 }
 0x11d   :  { %v1374_v26 = vadd.f32 %v755_v24, %v373_v25 }
 0x11f   :  { %v472_v27 = vsel %vm471_vm0, %v1374_v26, -inf  ;;  %v458_v3 = vsel %vm454_vm8, %v1374_v26, -inf  ;;  %v453_v14 = vmul.f32 %v452_v48, %v1374_v26 }
 0x120   :  { %473 = vmax.xlane.f32.xlu0 %v472_v27 }
 0x121   :  { %v455_v15 = vsel %vm454_vm8, %v453_v14, 0.0 }
 0x1ad   :  { %v474_v28 = vpop.xlane.xlu0 %473 }
 0x1ae   :  { %v475_v29 = vsub.f32 %v1374_v26, %v474_v28 }
 0x1b0   :  { %v476_v30 = vmul.f32 1.442695, %v475_v29 }
 0x1b2   :  { %906 = vpow2.f32 %v476_v30 }
 0x1bc   :  { %v907_v31 = vpop.eup %906 }
 0x1bd   :  { %v478_v32 = vsel %vm471_vm0, %v907_v31, 0.0 }
 0x1be   :  { %479 = vadd.xlane.f32.xlu0 %v478_v32 }
 0x24b   :  { %v480_v38 = vpop.xlane.xlu0 %479 }
 0x24c   :  { %908 = vlog2.f32 %v480_v38 }
 0x256   :  { %v909_v39 = vpop.eup %908 }
 0x257   :  { %v482_v40 = vmul.f32 0.6931472, %v909_v39 }
 0x259   :  { %v1386_v41 = vadd.f32 %v482_v40, %v474_v28 }
 0x25b   :  { %v485_v42 = vsub.f32 %v1374_v26, %v1386_v41 }
 0x25d   :  { %v486_v43 = vmul.f32 1.442695, %v485_v42 }
 0x25f   :  { %910 = vpow2.f32 %v486_v43 }
 0x269   :  { %v911_v47 = vpop.eup %910 }
 0x26a   :  { %v488_v49 = vsub.f32 %v911_v47, %v452_v48 }
 0x26c   :  { %764 = vmatmul.mubr.msk.f32.vlgmr.msra.gmra.mrb[4].mxu0 %vm471_vm0, %v488_v49 }
 0x33f   :  { %v562_v50 = vpop.f32.mrb[4].mxu0 }
 0x340   :  { %v566_v51 = vmul.f32 %v562_v50, %v488_v49  ;;  %v765_v52 = vpop.f32.mrb[5].mxu0 }
 0x342   :  { %v567_v53 = vsel %vm471_vm0, %v566_v51, 0.0 }
 0x343   :  { %568 = vadd.xlane.f32.xlu1 %v567_v53 }
 0x3d0   :  { %v569_v54 = vpop.xlane.xlu1 %568 }
 0x3d1   :  { %v570_v55 = vmax.f32 %v569_v54, 0.0 }
 0x3d3   :  { %912 = vrsqrt.f32 %v570_v55  ;;  %vm573_vm6 = vcmp.eq.f32.partialorder %v570_v55, inf  ;;  %v576_v58 = vand.u32 2147483648, %v570_v55  ;;  %vm575_vm7 = vcmp.eq.f32.partialorder %v570_v55, 0.0 }
 0x3dd   :  { %v913_v56 = vpop.eup %912 }
 0x3de   :  { %v572_v57 = vmul.f32 %v913_v56, %v570_v55 }
 0x3e0   :  { %v574_v59 = vsel %vm573_vm6, %v570_v55, %v572_v57 }
 0x3e1   :  { %v577_v60 = vsel %vm575_vm7, %v576_v58, %v574_v59 }
 0x3e2   :  { %v578_v61 = vadd.f32 1e-08, %v577_v60 }
 0x3e4   :  { %914 = vrcp.f32 %v578_v61 }
 0x3ee   :  { %v915_v62 = vpop.eup %914 }
 0x3ef   :  { %v580_v63 = vmul.f32 0.1, %v915_v62 }
 0x3f1   :  { %v581_v0 = vmul.f32 %v580_v63, %v562_v50 }
 0x3f3   :  { %v582_v1 = vadd.f32 %v581_v0, %v1374_v26 }
 0x3f5   :  { %v583_v2 = vsel %vm454_vm8, %v582_v1, -inf }
 0x3f6   :  { %584 = vmax.xlane.f32.xlu0 %v583_v2 }
 0x3fa   :  { %459 = vmax.xlane.f32.xlu0 %v458_v3 }
 0x483   :  { %v585_v4 = vpop.xlane.xlu0 %584 }
 0x484   :  { %v586_v5 = vsub.f32 %v582_v1, %v585_v4 }
 0x486   :  { %v587_v6 = vmul.f32 1.442695, %v586_v5 }
 0x487   :  { %v460_v7 = vpop.xlane.xlu0 %459 }
 0x488   :  { %916 = vpow2.f32 %v587_v6  ;;  %v461_v8 = vsub.f32 %v1374_v26, %v460_v7 }
 0x48a   :  { %v462_v9 = vmul.f32 1.442695, %v461_v8 }
 0x48c   :  { %918 = vpow2.f32 %v462_v9 }
 0x492   :  { %v917_v10 = vpop.eup %916 }
 0x493   :  { %v589_v11 = vsel %vm454_vm8, %v917_v10, 0.0 }
 0x494   :  { %590 = vadd.xlane.f32.xlu0 %v589_v11 }
 0x496   :  { %v919_v12 = vpop.eup %918 }
 0x497   :  { %v464_v13 = vsel %vm454_vm8, %v919_v12, 0.0 }
 0x498   :  { %465 = vadd.xlane.f32.xlu0 %v464_v13 }
 0x49c   :  { %456 = vadd.xlane.f32.xlu0 %v455_v15 }
 0x521   :  { %v591_v17 = vpop.xlane.xlu0 %590 }
 0x522   :  { %920 = vlog2.f32 %v591_v17 }
 0x525   :  { %v466_v22 = vpop.xlane.xlu0 %465 }
 0x526   :  { %922 = vlog2.f32 %v466_v22 }
 0x529   :  { %v457_v25 = vpop.xlane.xlu0 %456 }
 0x52a   :  { %v484_v26 = vsub.f32 %v1386_v41, %v457_v25 }
 0x52c   :  { %v921_v18 = vpop.eup %920 }
 0x52d   :  { %v593_v19 = vmul.f32 0.6931472, %v921_v18 }
 0x52f   :  { %v594_v20 = vadd.f32 %v593_v19, %v585_v4 }
 0x530   :  { %v923_v23 = vpop.eup %922 }
 0x531   :  { %v595_v21 = vsub.f32 %v594_v20, %v582_v1  ;;  %v468_v24 = vmul.f32 0.6931472, %v923_v23 }
 0x533   :  { %601 = vperm.xlu0 %905, %v595_v21   ;;  %v469_v27 = vadd.f32 %v468_v24, %v460_v7 }
 0x535   :  { %v470_v29 = vsub.f32 %v469_v27, %v457_v25 }
 0x5b2   :  { %v602_v28 = vpop.permute.xlu0 %601 }
 0x5b3   :  { %v604_v30 = vsel %vm598_vm9, %v577_v60, %v602_v28 }
 0x5b4   :  { %v605_v31 = vsel %vm597_vm10, %v484_v26, %v604_v30 }
 0x5b5   :  { %v606_v32 = vsel %vm596_vm11, %v470_v29, %v605_v31 }
 0x5b6   :  { %608 = vst.msk [vmem:[%s1416_s5] sm:$0xff] %vm607_vm12, %v606_v32 }

</bundles_post_ra>
